<compile_context>
chip_gen: v7x
topology: tpu7x:2x2x1
jax: 0.10.0
libtpu: 0.0.40
codegen_flags: <defaults>
</compile_context>

<pallas_src>
import functools

import jax
import jax.numpy as jnp
from jax.experimental import pallas as pl
from jax.experimental.pallas import tpu as pltpu

_LANE = 128     # lane width (last dim)
_SUBLANE = 8    # sublane width (second-to-last dim)
_NEG_BIG = jnp.float32(-1e30)   # "minus infinity" that cannot produce NaNs


def _round_up(x, m):
    return ((x + m - 1) // m) * m


def _classifier_kernel(x_ref, w_ref, b_ref, o_ref):
    # x_ref: (TB, Fp)   w_ref: (Fp, Op)   b_ref: (1, Op)   o_ref: (TB, Op)
    # Linear: logits = x @ W + b  (MXU matmul, f32 accumulation).
    logits = (
        jnp.dot(x_ref[...], w_ref[...], preferred_element_type=jnp.float32)
        + b_ref[...]
    )
    # Padded output columns carry bias = -1e30 -> exp() == 0, so they do not
    # contaminate the softmax denominator.
    m = jnp.max(logits, axis=-1, keepdims=True)
    e = jnp.exp(logits - m)
    s = jnp.sum(e, axis=-1, keepdims=True)
    # Exact normalization (full-precision reciprocal on the EUP): rows sum to
    # 1 within f32 rounding.  The approx reciprocal was not accurate enough.
    o_ref[...] = (e / s).astype(o_ref.dtype)


@functools.partial(jax.jit, static_argnames=("block_b", "use_bf16_matmul"))
def classifier_forward(x, w, b, *, block_b=512, use_bf16_matmul=False):
    """softmax(x @ w + b, axis=-1).

    x: (B, F) f32, w: (F, O) f32, b: (O,) f32  ->  (B, O) f32 probabilities.
    """
    B, F = x.shape
    O = w.shape[1]

    # Lane-dense padded sizes.
    Fp = _round_up(F, _LANE)
    Op = _round_up(O, _LANE)

    # Batch tile: multiple of 8, capped at block_b; pad B up to a whole tile.
    TB = min(_round_up(B, _SUBLANE), _round_up(block_b, _SUBLANE))
    Bp = _round_up(B, TB)
    grid_b = Bp // TB

    # Zero-pad x (extra rows/cols contribute nothing to the dot).
    xp = jnp.zeros((Bp, Fp), jnp.float32).at[:B, :F].set(x)
    # Zero-pad W along F and O.
    wp = jnp.zeros((Fp, Op), jnp.float32).at[:F, :O].set(w)
    # Bias: real columns get b, padded columns get -1e30 (masked softmax).
    bp = jnp.full((1, Op), _NEG_BIG, jnp.float32).at[0, :O].set(b)

    if use_bf16_matmul:
        # bf16 operands, f32 accumulation — halves x/W memory traffic on
        # v6e/v7x MXUs.  Bias/softmax remain f32.
        xp = xp.astype(jnp.bfloat16)
        wp = wp.astype(jnp.bfloat16)

    out_padded = pl.pallas_call(
        _classifier_kernel,
        out_shape=jax.ShapeDtypeStruct((Bp, Op), jnp.float32),
        grid_spec=pltpu.PrefetchScalarGridSpec(
            num_scalar_prefetch=0,
            grid=(grid_b,),
            in_specs=[
                pl.BlockSpec((TB, Fp), lambda i: (i, 0)),   # x: streamed per tile
                pl.BlockSpec((Fp, Op), lambda i: (0, 0)),   # W: resident
                pl.BlockSpec((1, Op), lambda i: (0, 0)),    # b: resident
            ],
            out_specs=pl.BlockSpec((TB, Op), lambda i: (i, 0)),
        ),
        compiler_params=pltpu.CompilerParams(
            dimension_semantics=("parallel",),
        ),
    )(xp, wp, bp)

    return out_padded[:B, :O]


def reference_forward(x, w, b):
    logits = x @ w + b[None, :]
    return jax.nn.softmax(logits, axis=-1)


if __name__ == "__main__":
    # Small shapes consistent with the module: batch=8, inputt=32, out=7
    B, IN, OUT = 8, 32, 7

    key = jax.random.PRNGKey(0)
    kx, kw, kb = jax.random.split(key, 3)

    x = jax.random.normal(kx, (B, IN), dtype=jnp.float32)

    # Deterministic parameter init mimicking nn.Linear (uniform +-1/sqrt(in))
    bound = 1.0 / jnp.sqrt(jnp.float32(IN))
    w = jax.random.uniform(kw, (IN, OUT), jnp.float32, -bound, bound)
    b = jax.random.uniform(kb, (OUT,), jnp.float32, -bound, bound)

    out = classifier_forward(x, w, b)
    out = jax.block_until_ready(out)

    ref = reference_forward(x, w, b)
    assert out.shape == (B, OUT), f"bad shape {out.shape}"
    assert jnp.allclose(out, ref, atol=1e-4, rtol=1e-4), "mismatch vs reference"
    assert jnp.allclose(jnp.sum(out, axis=-1), 1.0, atol=1e-4), "rows must sum to 1"

    print("KERNEL_OK")
</pallas_src>

<mosaic_0001>
module attributes {stable_mosaic.version = 11 : i64} {
  func.func @_classifier_kernel(%arg0: i32, %arg1: memref<8x128xf32, #tpu.memory_space<vmem>>, %arg2: memref<128x128xf32, #tpu.memory_space<vmem>>, %arg3: memref<1x128xf32, #tpu.memory_space<vmem>>, %arg4: memref<8x128xf32, #tpu.memory_space<vmem>>) attributes {dimension_semantics = [#tpu.dimension_semantics<parallel>], iteration_bounds = array<i64: 1>, scalar_prefetch = 0 : i64, scratch_operands = 0 : i64, tpu.core_type = #tpu.core_type<tc>, window_params = [{transform_indices = @transform_0, window_bounds = array<i64: 8, 128>}, {pipeline_mode = #tpu.pipeline_mode<synchronous>, transform_indices = @transform_1, window_bounds = array<i64: 128, 128>}, {pipeline_mode = #tpu.pipeline_mode<synchronous>, transform_indices = @transform_2, window_bounds = array<i64: 1, 128>}, {transform_indices = @transform_3, window_bounds = array<i64: 8, 128>}]} {
    %c0 = arith.constant 0 : index
    %c0_0 = arith.constant 0 : index
    %0 = vector.load %arg1[%c0, %c0_0] : memref<8x128xf32, #tpu.memory_space<vmem>>, vector<8x128xf32>
    %c0_1 = arith.constant 0 : index
    %c0_2 = arith.constant 0 : index
    %1 = vector.load %arg2[%c0_1, %c0_2] : memref<128x128xf32, #tpu.memory_space<vmem>>, vector<128x128xf32>
    %cst = arith.constant dense<0.000000e+00> : vector<8x128xf32>
    %2 = tpu.matmul %0, %1, %cst {dimension_numbers = #tpu.dot_dimension_numbers<[1], [0], [0], [1], [0, 0, 1, 1], [], []>} : vector<8x128xf32>, vector<128x128xf32>, vector<8x128xf32> -> vector<8x128xf32>
    %c0_3 = arith.constant 0 : index
    %c0_4 = arith.constant 0 : index
    %3 = vector.load %arg3[%c0_3, %c0_4] : memref<1x128xf32, #tpu.memory_space<vmem>>, vector<1x128xf32>
    %4 = vector.broadcast %3 : vector<1x128xf32> to vector<8x128xf32>
    %5 = arith.addf %2, %4 : vector<8x128xf32>
    %cst_5 = arith.constant dense<0xFF800000> : vector<8xf32>
    %6 = vector.multi_reduction <maximumf>, %5, %cst_5 [1] : vector<8x128xf32> to vector<8xf32>
    %7 = vector.shape_cast %6 : vector<8xf32> to vector<8x1xf32>
    %8 = vector.broadcast %7 : vector<8x1xf32> to vector<8x128xf32>
    %9 = arith.subf %5, %8 : vector<8x128xf32>
    %10 = math.exp %9 : vector<8x128xf32>
    %cst_6 = arith.constant dense<0.000000e+00> : vector<8xf32>
    %11 = vector.multi_reduction <add>, %10, %cst_6 [1] : vector<8x128xf32> to vector<8xf32>
    %12 = vector.shape_cast %11 : vector<8xf32> to vector<8x1xf32>
    %13 = vector.broadcast %12 : vector<8x1xf32> to vector<8x128xf32>
    %14 = arith.divf %10, %13 : vector<8x128xf32>
    %c0_7 = arith.constant 0 : index
    %c0_8 = arith.constant 0 : index
    %15 = vector.load %arg4[%c0_7, %c0_8] : memref<8x128xf32, #tpu.memory_space<vmem>>, vector<8x128xf32>
    tpu.vector_store %arg4[%c0_7, %c0_8], %14 {strides = array<i32>} : memref<8x128xf32, #tpu.memory_space<vmem>>, vector<8x128xf32>,
    return
  }
  func.func @transform_0(%arg0: i32) -> (i32, i32) {
    %c0_i32 = arith.constant 0 : i32
    %c0_i32_0 = arith.constant 0 : i32
    return %arg0, %c0_i32 : i32, i32
  }
  func.func @transform_1(%arg0: i32) -> (i32, i32) {
    %c0_i32 = arith.constant 0 : i32
    %c0_i32_0 = arith.constant 0 : i32
    %c0_i32_1 = arith.constant 0 : i32
    return %c0_i32, %c0_i32_0 : i32, i32
  }
  func.func @transform_2(%arg0: i32) -> (i32, i32) {
    %c0_i32 = arith.constant 0 : i32
    %c0_i32_0 = arith.constant 0 : i32
    %c0_i32_1 = arith.constant 0 : i32
    return %c0_i32, %c0_i32_0 : i32, i32
  }
  func.func @transform_3(%arg0: i32) -> (i32, i32) {
    %c0_i32 = arith.constant 0 : i32
    %c0_i32_0 = arith.constant 0 : i32
    return %arg0, %c0_i32 : i32, i32
  }
}

</mosaic_0001>

<bundles_post_ra>
// kernel: classifier_forward.1
= control target key start
LH: loop header
LB: loop body
LE: loop exit
PB: predicated region body
PF: predicated region fallthrough
CT: control target
= control target key end

     0   :  { %v242_v3 = vmov 0.0|0.0   ;;  %vm243_vm0 = vmmov 0   ;;  %v244_v6 = vmov 0.0   ;;  %s332_s0 = inlined_call_operand.vmem [shape: f32[8,128], index: 0, kind: input, shape index: {}]   ;;  %s333_s1 = inlined_call_operand.vmem [shape: f32[128,128], index: 1, kind: input, shape index: {}]   ;;  %s334_s2 = inlined_call_operand.vmem [shape: f32[1,128], index: 2, kind: input, shape index: {}]   ;;  %s335_s3 = inlined_call_operand.hbm [shape: f32[8,128], index: 3, kind: output, shape index: {}]  }
   0x1   :  { %v16_v0 = vld [vmem:[%s333_s1] sm:$0xff]  ;;  %v17_v1 = vld [vmem:[%s333_s1 + $0x8] sm:$0xff]  ;;  %v18_v2 = vld [vmem:[%s333_s1 + $0x10] sm:$0xff]  ;;  %186 = vmatprep.subr.bf16.mxu0 %v242_v3  ;;  %183 = vmatprep.mubr.msk.f32.mxu0 %vm243_vm0, %v244_v6 }
   0x2   :  { %v187_v4 = vpack.c.bf16 %v17_v1, %v16_v0  ;;  %v19_v5 = vld [vmem:[%s333_s1 + $0x18] sm:$0xff]  ;;  %v20_v8 = vld [vmem:[%s333_s1 + $0x20] sm:$0xff]  ;;  %v21_v9 = vld [vmem:[%s333_s1 + $0x28] sm:$0xff] }
   0x3   :  { %v190_v7 = vpack.c.bf16 %v19_v5, %v18_v2 }
   0x4   :  { %188 = vmatpush3.bf16.msra.mxu0 %v187_v4 }
   0x5   :  { %189 = vmatprep.subr.bf16.mxu0 %v242_v3 }
   0x6   :  { %8 = vsyncpa [#allocation3], 0  ;;  %v193_v10 = vpack.c.bf16 %v21_v9, %v20_v8  ;;  %v22_v11 = vld [vmem:[%s333_s1 + $0x30] sm:$0xff]  ;;  %v23_v12 = vld [vmem:[%s333_s1 + $0x38] sm:$0xff] }
   0x7   :  { %v196_v13 = vpack.c.bf16 %v23_v12, %v22_v11  ;;  %v24_v14 = vld [vmem:[%s333_s1 + $0x40] sm:$0xff]  ;;  %v25_v15 = vld [vmem:[%s333_s1 + $0x48] sm:$0xff]  ;;  %v26_v17 = vld [vmem:[%s333_s1 + $0x50] sm:$0xff] }
   0x8   :  { %191 = vmatpush3.bf16.msra.mxu0 %v190_v7  ;;  %v199_v16 = vpack.c.bf16 %v25_v15, %v24_v14  ;;  %v27_v18 = vld [vmem:[%s333_s1 + $0x58] sm:$0xff]  ;;  %v28_v20 = vld [vmem:[%s333_s1 + $0x60] sm:$0xff]  ;;  %v29_v21 = vld [vmem:[%s333_s1 + $0x68] sm:$0xff] }
   0x9   :  { %192 = vmatprep.subr.bf16.mxu0 %v242_v3  ;;  %v202_v19 = vpack.c.bf16 %v27_v18, %v26_v17  ;;  %v205_v22 = vpack.c.bf16 %v29_v21, %v28_v20  ;;  %v30_v23 = vld [vmem:[%s333_s1 + $0x70] sm:$0xff]  ;;  %v31_v24 = vld [vmem:[%s333_s1 + $0x78] sm:$0xff]  ;;  %v15_v26 = vld [vmem:[%s332_s0] sm:$0xff]  ;;  %s245_s1 = smov [#allocation2]  }
   0xa   :  { %v208_v25 = vpack.c.bf16 %v31_v24, %v30_v23  ;;  %v133_v27 = vld [vmem:[%s334_s2] ss:$0 sm:$0xff]  ;;  %s125_s21 = sshll.u32 %s245_s1, 4  ;;  %s126_s21 = int_to_ptr.vmem [resolvable:$true] %s125_s21 }
   0xb   :  { %s218_s0 = scalar_lea.vmem %s126_s21, 128  ;;  %p223_p1 = scmp.lt.s32.totalorder %s126_s21, %s126_s21 }
   0xc   :  { %194 = vmatpush3.bf16.msra.mxu0 %v193_v10  ;;  %p219_p0 = scmp.ne.s32.totalorder %s126_s21, %s218_s0  ;;  %p224_p2 = scmp.lt.s32.totalorder %s218_s0, %s218_s0 }
   0xd   :  { %195 = vmatprep.subr.bf16.mxu0 %v242_v3 }
   0xe   :  { %p225_p3 = por %p224_p2, %p223_p1 }
  0x10   :  { %197 = vmatpush3.bf16.msra.mxu0 %v196_v13  ;;  %p226_p4 = pnand %p225_p3, %p219_p0 }
  0x11   :  { %198 = vmatprep.subr.bf16.mxu0 %v242_v3 }
  0x14   :  { %200 = vmatpush3.bf16.msra.mxu0 %v199_v16 }
  0x15   :  { %201 = vmatprep.subr.bf16.mxu0 %v242_v3 }
  0x18   :  { %203 = vmatpush3.bf16.msra.mxu0 %v202_v19 }
  0x19   :  { %204 = vmatprep.subr.bf16.mxu0 %v242_v3 }
  0x1c   :  { %206 = vmatpush3.bf16.msra.mxu0 %v205_v22 }
  0x1d   :  { %207 = vmatprep.subr.bf16.mxu0 %v242_v3 }
  0x20   :  { %209 = vmatpush3.bf16.msra.mxu0 %v208_v25 }
  0x23   :  { %184 = vmatmul.mubr.f32.vlgmr.msra.gmra.mrb[0].mxu0 %v15_v26 }
  0xf6   :  { %v105_v28 = vpop.f32.mrb[0].mxu0 }
  0xf7   :  { %v106_v29 = vadd.f32 %v133_v27, %v105_v28  ;;  %v185_v30 = vpop.f32.mrb[1].mxu0 }
  0xf9   :  { %109 = vmax.xlane.f32.xlu0 %v106_v29 }
 0x186   :  { %v110_v31 = vpop.xlane.xlu0 %109 }
 0x187   :  { %v111_v32 = vsub.f32 %v106_v29, %v110_v31 }
 0x189   :  { %v112_v33 = vmul.f32 1.442695, %v111_v32 }
 0x18b   :  { %214 = vpow2.f32 %v112_v33 }
 0x195   :  { %v215_v34 = vpop.eup %214 }
 0x196   :  { %114 = vadd.xlane.f32.xlu0 %v215_v34 }
 0x223   :  { %v115_v35 = vpop.xlane.xlu0 %114 }
 0x224   :  { %216 = vrcp.f32 %v115_v35 }
 0x22e   :  { %v217_v36 = vpop.eup %216 }
 0x22f   :  { %v117_v37 = vmul.f32 %v217_v36, %v215_v34 }
 0x231   :  { %118 = vst [vmem:[#allocation2] sm:$0xff] %v117_v37 }
 0x232   :  { %229 = shalt.err (!%p226_p4)
}
 0x233   :  { %s230_s23 = scalar_lea.hbm %s335_s3, 128 }
 0x234   :  { %p231_p5 = scmp.ne.s32.totalorder %s335_s3, %s230_s23  ;;  %p234_p6 = scmp.lt.u32.totalorder %s230_s23, %s335_s3 }
 0x236   :  { %p236_p7 = pnand %p234_p6, %p231_p5 }
 0x238   :  { %239 = shalt.err (!%p236_p7)
}
 0x239   :  { %128 = dma.vmem_to_hbm [thread:$0]  %s126_s21, 128, %s335_s3, [#allocation3]  }
 0x23a   :  { %240 = dma.done.wait [#allocation3], 128  }
 0x23b   :  { %241 = vsyncadd [#allocation3], 4294967168 }
 0x23c   :  { %132 = vsyncpa [#allocation3], 1 }

</bundles_post_ra>
